<compile_context>
chip_gen: v5e
topology: v5e:2x2
jax: 0.10.0
libtpu: 0.0.40
codegen_flags: <defaults>
</compile_context>

<pallas_src>
import math

import jax
import jax.numpy as jnp
from jax import lax
from jax.experimental import pallas as pl
from jax.experimental.pallas import tpu as pltpu

_LOG_2PI = math.log(2.0 * math.pi)


def _pick_tile_n(n):
    """Largest multiple-of-8 divisor of n, capped at 1024 (VMEM-friendly on v7x)."""
    best = None
    for t in range(8, min(n, 1024) + 1, 8):
        if n % t == 0:
            best = t
    return best if best is not None else n


def _make_em_step(N, D, M, tile_n):
    """Builds a pallas_call computing resp + EM sufficient statistics for one
    iteration, tiled over N."""
    K = D * D + D + 1          # quadratic features + linear + constant
    S = M + M * D              # stats rows: [resp^T | (resp*x_d)^T] blocks

    def em_step_kernel(x_ref, params_ref, resp_ref, stats_ref):
        i = pl.program_id(0)

        x = x_ref[...]                                   # [T, D] f32
        params = params_ref[...]                         # [K, M] f32
        t = x.shape[0]
        ones = jnp.ones((t, 1), dtype=jnp.float32)

        # ---------------- E step (one MXU matmul) ----------------
        # feats[n, d*D+k] = x[n,d]*x[n,k];  feats[n, D*D+d] = x[n,d];  last col = 1
        quad = [x[:, d:d + 1] * x for d in range(D)]     # D pieces of [T, D]
        feats = jnp.concatenate(quad + [x, ones], axis=1)          # [T, K]
        logits = jnp.dot(feats, params,
                         preferred_element_type=jnp.float32)       # [T, M]
        # logits[n,m] = -0.5*(x-mu_m)^T Q_m (x-mu_m) + log(mixc_m) + log_norm_m

        # log-domain softmax over components (numerically safe)
        m_row = jnp.max(logits, axis=-1, keepdims=True)
        p = jnp.exp(logits - m_row)
        denom = jnp.sum(p, axis=-1, keepdims=True)
        r = pl.reciprocal(denom, approx=True)            # EUP slot
        r = r * (2.0 - denom * r)                        # one Newton step -> ~f32
        resp = p * r                                     # [T, M]
        resp_ref[...] = resp

        # ---------------- M step sufficient stats (one MXU matmul) ----------
        # w_aug[n, :M]          = resp[n, :]
        # w_aug[n, M + m*D + d] = resp[n, m] * x[n, d]
        w_aug = jnp.concatenate(
            [resp] + [resp[:, m:m + 1] * x for m in range(M)], axis=1)   # [T, S]
        x_aug = jnp.concatenate([x, ones], axis=1)                        # [T, D+1]
        # contract over the tile rows without materializing a transpose
        tile_stats = lax.dot_general(
            w_aug, x_aug,
            dimension_numbers=(((0,), (0,)), ((), ())),
            preferred_element_type=jnp.float32)                           # [S, D+1]
        # rows 0..M-1   : [ resp^T x | sum_n resp ]          (S1 | mix_resp)
        # rows M..S-1   : [ sum_n resp*x_d*x_t | resp^T x_d ] (S2 flat)

        @pl.when(i == 0)
        def _init():
            stats_ref[...] = jnp.zeros_like(stats_ref)

        stats_ref[...] += tile_stats

    return pl.pallas_call(
        em_step_kernel,
        grid=(N // tile_n,),
        in_specs=[
            pl.BlockSpec((tile_n, D), lambda i: (i, 0)),      # x (streamed)
            pl.BlockSpec((K, M), lambda i: (0, 0)),           # packed params
        ],
        out_specs=[
            pl.BlockSpec((tile_n, M), lambda i: (i, 0)),      # resp
            pl.BlockSpec((S, D + 1), lambda i: (0, 0)),       # stats accumulator
        ],
        out_shape=(
            jax.ShapeDtypeStruct((N, M), jnp.float32),
            jax.ShapeDtypeStruct((S, D + 1), jnp.float32),
        ),
        compiler_params=pltpu.CompilerParams(
            # stats block is revisited across the N-tile axis -> "arbitrary"
            dimension_semantics=("arbitrary",),
            # explicit VMEM budget: safe on v5e/v6e (128 MiB) and v7x (64 MiB)
            vmem_limit_bytes=32 * 1024 * 1024,
        ),
    )


def _iteration_params(means, covs, mixc, D):
    """Tiny per-iteration glue: DxD inverse/log-det and log-domain coefficient
    packing (review item: fold constants / B / c outside the kernel)."""
    covs_inv = jnp.linalg.inv(covs)                        # [M, D, D]
    _, logabsdet = jnp.linalg.slogdet(covs)                # [M]; det_inv = exp(-logabsdet)
    b = jnp.einsum('mdk,mk->md', covs_inv, means)          # [M, D]  (Q mu)
    c = jnp.einsum('md,md->m', b, means)                   # [M]     (mu^T Q mu)
    bias = (-0.5 * c - 0.5 * logabsdet - 0.5 * D * _LOG_2PI
            + jnp.log(mixc))                               # [M]
    q_rows = -0.5 * covs_inv.reshape(covs_inv.shape[0], D * D)   # [M, D*D]
    params_mk = jnp.concatenate([q_rows, b, bias[:, None]], axis=1)  # [M, K]
    return jnp.transpose(params_mk)                        # [K, M] for feats @ params


def gmm_forward(x, means, covs, mixc, niter, tile_n=None):
    """Matches GMM.forward(x, Niter). Returns (means, covs, mixc, resp, mix_resp)."""
    N, D = x.shape
    M = means.shape[0]
    if tile_n is None:
        tile_n = _pick_tile_n(N)
    assert N % tile_n == 0, "N must be divisible by tile_n"
    em_step = _make_em_step(N, D, M, tile_n)

    resp = None
    mix_resp = None
    for _ in range(niter):
        params = _iteration_params(means, covs, mixc, D)
        resp, stats = em_step(x, params)
        # finalize from accumulated sufficient statistics (O(M*D^2) glue)
        s1 = stats[:M, :D]                       # sum_n resp[n,m] x[n,d]
        mr = stats[:M, D]                        # sum_n resp[n,m]
        s2 = stats[M:, :D].reshape(M, D, D)      # sum_n resp[n,m] x[n,d] x[n,t]
        mix_resp = mr
        means = s1 / mr[:, None]
        covs = (s2 / mr[:, None, None]
                - means[:, :, None] * means[:, None, :])
        mixc = mr / N
    return means, covs, mixc, resp, mix_resp


def gmm_reference(x, means, covs, mixc, niter):
    """Pure-JAX reference reproducing the PyTorch semantics."""
    N, D = x.shape
    resp = None
    mix_resp = None
    for _ in range(niter):
        xc = x[:, None, :] - means[None, :, :]
        covs_inv = jnp.linalg.inv(covs)
        xTQx = jnp.einsum('NMD,MDK,NMK->NM', xc, covs_inv, xc)
        lik = (jnp.sqrt(jnp.linalg.det(covs_inv)) * jnp.exp(-0.5 * xTQx)
               / (2.0 * jnp.pi) ** (D / 2.0))
        unnorm = lik * mixc[None, :]
        resp = unnorm / unnorm.sum(axis=-1, keepdims=True)
        mix_resp = resp.sum(axis=0)
        alphas = resp / mix_resp[None, :]
        means = jnp.einsum('NM,ND->MD', alphas, x)
        x_zm = x[:, None, :] - means[None, :, :]
        covs = jnp.einsum('NM,NMD,NMT->MDT', alphas, x_zm, x_zm)
        mixc = mix_resp / N
    return means, covs, mixc, resp, mix_resp


if __name__ == "__main__":
    N, D, M, NITER = 16, 4, 4, 3

    key = jax.random.PRNGKey(0)
    k_x, k_mu = jax.random.split(key)
    x = jax.random.normal(k_x, (N, D), dtype=jnp.float32)
    means0 = 0.5 * jax.random.normal(k_mu, (M, D), dtype=jnp.float32)
    covs0 = jnp.tile(jnp.eye(D, dtype=jnp.float32)[None], (M, 1, 1))
    mixc0 = jnp.full((M,), 1.0 / M, dtype=jnp.float32)

    # tile_n=8 -> grid of 2 tiles, exercising the cross-tile accumulation path.
    out = gmm_forward(x, means0, covs0, mixc0, NITER, tile_n=8)
    out = jax.block_until_ready(out)
    means, covs, mixc, resp, mix_resp = out

    ref = gmm_reference(x, means0, covs0, mixc0, NITER)
    names = ("means", "covs", "mixc", "resp", "mix_resp")
    for name, got, want in zip(names, out, ref):
        assert got.shape == want.shape, f"shape mismatch in {name}"
        assert jnp.all(jnp.isfinite(got)), f"non-finite values in {name}"
        assert jnp.allclose(got, want, rtol=2e-3, atol=1e-4), f"mismatch in {name}"

    print("KERNEL_OK")
</pallas_src>

<mosaic_0001>
module attributes {stable_mosaic.version = 11 : i64} {
  func.func @em_step_kernel(%arg0: i32, %arg1: memref<8x4xf32, #tpu.memory_space<vmem>>, %arg2: memref<21x4xf32, #tpu.memory_space<vmem>>, %arg3: memref<8x4xf32, #tpu.memory_space<vmem>>, %arg4: memref<20x5xf32, #tpu.memory_space<vmem>>) attributes {dimension_semantics = [#tpu.dimension_semantics<arbitrary>], iteration_bounds = array<i64: 2>, scalar_prefetch = 0 : i64, scratch_operands = 0 : i64, tpu.core_type = #tpu.core_type<tc>, window_params = [{transform_indices = @transform_0, window_bounds = array<i64: 8, 4>}, {pipeline_mode = #tpu.pipeline_mode<synchronous>, transform_indices = @transform_1, window_bounds = array<i64: 21, 4>}, {transform_indices = @transform_2, window_bounds = array<i64: 8, 4>}, {pipeline_mode = #tpu.pipeline_mode<synchronous>, transform_indices = @transform_3, window_bounds = array<i64: 20, 5>}]} {
    %c0 = arith.constant 0 : index
    %c0_0 = arith.constant 0 : index
    %0 = vector.load %arg1[%c0, %c0_0] : memref<8x4xf32, #tpu.memory_space<vmem>>, vector<8x4xf32>
    %c0_1 = arith.constant 0 : index
    %c0_2 = arith.constant 0 : index
    %1 = vector.load %arg2[%c0_1, %c0_2] : memref<21x4xf32, #tpu.memory_space<vmem>>, vector<21x4xf32>
    %cst = arith.constant 1.000000e+00 : f32
    %2 = vector.broadcast %cst : f32 to vector<8x1xf32>
    %3 = vector.extract_strided_slice %0 {offsets = [0, 0], sizes = [8, 1], strides = [1, 1]} : vector<8x4xf32> to vector<8x1xf32>
    %4 = vector.broadcast %3 : vector<8x1xf32> to vector<8x4xf32>
    %5 = arith.mulf %4, %0 : vector<8x4xf32>
    %6 = vector.extract_strided_slice %0 {offsets = [0, 1], sizes = [8, 1], strides = [1, 1]} : vector<8x4xf32> to vector<8x1xf32>
    %7 = vector.broadcast %6 : vector<8x1xf32> to vector<8x4xf32>
    %8 = arith.mulf %7, %0 : vector<8x4xf32>
    %9 = vector.extract_strided_slice %0 {offsets = [0, 2], sizes = [8, 1], strides = [1, 1]} : vector<8x4xf32> to vector<8x1xf32>
    %10 = vector.broadcast %9 : vector<8x1xf32> to vector<8x4xf32>
    %11 = arith.mulf %10, %0 : vector<8x4xf32>
    %12 = vector.extract_strided_slice %0 {offsets = [0, 3], sizes = [8, 1], strides = [1, 1]} : vector<8x4xf32> to vector<8x1xf32>
    %13 = vector.broadcast %12 : vector<8x1xf32> to vector<8x4xf32>
    %14 = arith.mulf %13, %0 : vector<8x4xf32>
    %15 = tpu.concatenate %5, %8, %11, %14, %0, %2 in 1 : vector<8x4xf32>, vector<8x4xf32>, vector<8x4xf32>, vector<8x4xf32>, vector<8x4xf32>, vector<8x1xf32> -> vector<8x21xf32>
    %cst_3 = arith.constant dense<0.000000e+00> : vector<8x4xf32>
    %16 = tpu.matmul %15, %1, %cst_3 {dimension_numbers = #tpu.dot_dimension_numbers<[1], [0], [0], [1], [0, 0, 1, 1], [], []>} : vector<8x21xf32>, vector<21x4xf32>, vector<8x4xf32> -> vector<8x4xf32>
    %cst_4 = arith.constant dense<0xFF800000> : vector<8xf32>
    %17 = vector.multi_reduction <maximumf>, %16, %cst_4 [1] : vector<8x4xf32> to vector<8xf32>
    %18 = vector.shape_cast %17 : vector<8xf32> to vector<8x1xf32>
    %19 = vector.broadcast %18 : vector<8x1xf32> to vector<8x4xf32>
    %20 = arith.subf %16, %19 : vector<8x4xf32>
    %21 = math.exp %20 : vector<8x4xf32>
    %cst_5 = arith.constant dense<0.000000e+00> : vector<8xf32>
    %22 = vector.multi_reduction <add>, %21, %cst_5 [1] : vector<8x4xf32> to vector<8xf32>
    %23 = vector.shape_cast %22 : vector<8xf32> to vector<8x1xf32>
    %24 = tpu.reciprocal %23 {approx = true} : vector<8x1xf32> -> vector<8x1xf32>
    %25 = arith.mulf %23, %24 : vector<8x1xf32>
    %cst_6 = arith.constant 2.000000e+00 : f32
    %26 = vector.broadcast %cst_6 : f32 to vector<8x1xf32>
    %27 = arith.subf %26, %25 : vector<8x1xf32>
    %28 = arith.mulf %24, %27 : vector<8x1xf32>
    %29 = vector.broadcast %28 : vector<8x1xf32> to vector<8x4xf32>
    %30 = arith.mulf %21, %29 : vector<8x4xf32>
    %c0_7 = arith.constant 0 : index
    %c0_8 = arith.constant 0 : index
    %31 = vector.load %arg3[%c0_7, %c0_8] : memref<8x4xf32, #tpu.memory_space<vmem>>, vector<8x4xf32>
    tpu.vector_store %arg3[%c0_7, %c0_8], %30 {strides = array<i32>} : memref<8x4xf32, #tpu.memory_space<vmem>>, vector<8x4xf32>,
    %32 = vector.extract_strided_slice %30 {offsets = [0, 0], sizes = [8, 1], strides = [1, 1]} : vector<8x4xf32> to vector<8x1xf32>
    %33 = vector.broadcast %32 : vector<8x1xf32> to vector<8x4xf32>
    %34 = arith.mulf %33, %0 : vector<8x4xf32>
    %35 = vector.extract_strided_slice %30 {offsets = [0, 1], sizes = [8, 1], strides = [1, 1]} : vector<8x4xf32> to vector<8x1xf32>
    %36 = vector.broadcast %35 : vector<8x1xf32> to vector<8x4xf32>
    %37 = arith.mulf %36, %0 : vector<8x4xf32>
    %38 = vector.extract_strided_slice %30 {offsets = [0, 2], sizes = [8, 1], strides = [1, 1]} : vector<8x4xf32> to vector<8x1xf32>
    %39 = vector.broadcast %38 : vector<8x1xf32> to vector<8x4xf32>
    %40 = arith.mulf %39, %0 : vector<8x4xf32>
    %41 = vector.extract_strided_slice %30 {offsets = [0, 3], sizes = [8, 1], strides = [1, 1]} : vector<8x4xf32> to vector<8x1xf32>
    %42 = vector.broadcast %41 : vector<8x1xf32> to vector<8x4xf32>
    %43 = arith.mulf %42, %0 : vector<8x4xf32>
    %44 = tpu.concatenate %30, %34, %37, %40, %43 in 1 : vector<8x4xf32>, vector<8x4xf32>, vector<8x4xf32>, vector<8x4xf32>, vector<8x4xf32> -> vector<8x20xf32>
    %45 = tpu.concatenate %0, %2 in 1 : vector<8x4xf32>, vector<8x1xf32> -> vector<8x5xf32>
    %cst_9 = arith.constant dense<0.000000e+00> : vector<20x5xf32>
    %46 = tpu.matmul %44, %45, %cst_9 {dimension_numbers = #tpu.dot_dimension_numbers<[0], [0], [1], [1], [0, 1, 1, 1], [], []>} : vector<8x20xf32>, vector<8x5xf32>, vector<20x5xf32> -> vector<20x5xf32>
    %c0_i32 = arith.constant 0 : i32
    %47 = arith.cmpi eq, %arg0, %c0_i32 : i32
    %48 = arith.extui %47 : i1 to i32
    %c0_i32_10 = arith.constant 0 : i32
    %49 = arith.cmpi ne, %48, %c0_i32_10 : i32
    scf.if %49 {
      %cst_15 = arith.constant 0.000000e+00 : f32
      %53 = vector.broadcast %cst_15 : f32 to vector<20x5xf32>
      %c0_16 = arith.constant 0 : index
      %c0_17 = arith.constant 0 : index
      %54 = vector.load %arg4[%c0_16, %c0_17] : memref<20x5xf32, #tpu.memory_space<vmem>>, vector<20x5xf32>
      tpu.vector_store %arg4[%c0_16, %c0_17], %53 {strides = array<i32>} : memref<20x5xf32, #tpu.memory_space<vmem>>, vector<20x5xf32>,
    } else {
    }
    %c0_11 = arith.constant 0 : index
    %c0_12 = arith.constant 0 : index
    %50 = vector.load %arg4[%c0_11, %c0_12] : memref<20x5xf32, #tpu.memory_space<vmem>>, vector<20x5xf32>
    %51 = arith.addf %50, %46 : vector<20x5xf32>
    %c0_13 = arith.constant 0 : index
    %c0_14 = arith.constant 0 : index
    %52 = vector.load %arg4[%c0_13, %c0_14] : memref<20x5xf32, #tpu.memory_space<vmem>>, vector<20x5xf32>
    tpu.vector_store %arg4[%c0_13, %c0_14], %51 {strides = array<i32>} : memref<20x5xf32, #tpu.memory_space<vmem>>, vector<20x5xf32>,
    return
  }
  func.func @transform_0(%arg0: i32) -> (i32, i32) {
    %c0_i32 = arith.constant 0 : i32
    %c0_i32_0 = arith.constant 0 : i32
    return %arg0, %c0_i32 : i32, i32
  }
  func.func @transform_1(%arg0: i32) -> (i32, i32) {
    %c0_i32 = arith.constant 0 : i32
    %c0_i32_0 = arith.constant 0 : i32
    %c0_i32_1 = arith.constant 0 : i32
    return %c0_i32, %c0_i32_0 : i32, i32
  }
  func.func @transform_2(%arg0: i32) -> (i32, i32) {
    %c0_i32 = arith.constant 0 : i32
    %c0_i32_0 = arith.constant 0 : i32
    return %arg0, %c0_i32 : i32, i32
  }
  func.func @transform_3(%arg0: i32) -> (i32, i32) {
    %c0_i32 = arith.constant 0 : i32
    %c0_i32_0 = arith.constant 0 : i32
    %c0_i32_1 = arith.constant 0 : i32
    return %c0_i32, %c0_i32_0 : i32, i32
  }
}

</mosaic_0001>

<bundles_post_ra>
// kernel: tpu_custom_call.1
= control target key start
LH: loop header
LB: loop body
LE: loop exit
PB: predicated region body
PF: predicated region fallthrough
CT: control target
= control target key end

     0   :  { %s530_s12 = smov 0   ;;  %s641_s0 = inlined_call_operand.vmem [shape: f32[16,4], index: 0, kind: input, shape index: {}]   ;;  %s642_s1 = inlined_call_operand.vmem [shape: f32[21,4], index: 1, kind: input, shape index: {}]   ;;  %s643_s2 = inlined_call_operand.vmem [shape: f32[16,4], index: 2, kind: output, shape index: {0}]   ;;  %s644_s3 = inlined_call_operand.vmem [shape: f32[20,5], index: 3, kind: output, shape index: {1}]  }
   0x1 LB: > { %s536_s13 = sadd.s32 4294967295, %s499_s12   ;;  %p449_p0 = scmp.ge.s32.totalorder %s499_s12, 1  ;;  %s499_s12 = sphi %s530_s12, %s14_s12  }
   0x2   : > { %p134_p1 = scmp.lt.s32.totalorder %s499_s12, 3 }
   0x4   : > { %p135_p2 = pnand %p449_p0, %p134_p1 }
   0x5   : > { %p156_p3 = scmp.lt.s32.totalorder (!%p135_p2), %s536_s13, 1  ;;  %s505_s19 = smov (!%p135_p2), 12  }
   0x6   : > { %138 = sbr.rel (%p135_p2) target bundleno = 1189 (0x4a5), region = 28  ;;  %s506_s20 = smov (!%p135_p2), 4  }
   0x7   : > { %s507_s21 = smov (!%p135_p2), 8   ;;  %s508_s22 = smov (!%p135_p2), 16  }
   0x8   : > { %p457_p4 = scmp.ne.s32.totalorder (!%p135_p2), %s536_s13, 0 }
   0xb   : > { %v501_v0 = vmov 3   ;;  %v502_v1 = vmov 1   ;;  %s544_s14 = scalar_select %p156_p3, %s536_s13, 1  ;;  %v503_v2 = vmov 0   ;;  %v504_v4 = vmov 2   ;;  %v166_v12 = vld [vmem:[%s642_s1 + $0x8] sm:$0xff] }
   0xc   : > { %482 = vset.pattern.permute.xlu1 %v501_v0  ;;  %480 = vset.pattern.permute.xlu0 %v502_v1  ;;  %v167_v11 = vld [vmem:[%s642_s1 + $0x10] sm:$0x1f]  ;;  %vm218_vm0 = vcmask 1044480   ;;  %v165_v13 = vld [vmem:[%s642_s1] sm:$0xff]  ;;  %vm204_vm1 = vcmask 31744   ;;  %vm206_vm2 = vcmask 64512  }
   0xd   : > { %484 = vset.pattern.permute.xlu2 %v503_v2  ;;  %s450_s15 = sshll.u32 %s544_s14, 3  ;;  %452 = vmatpush.msk.msra.mxu0 %vm218_vm0, %v167_v11  ;;  %vm208_vm3 = vcmask 97280   ;;  %vm210_vm4 = vcmask 130048   ;;  %vm212_vm5 = vcmask 162816   ;;  %vm214_vm6 = vcmask 171008  }
   0xe   : > { %s159_s18 = scalar_lea.vmem %s641_s0, %s450_s15  ;;  %s163_s4 = scalar_lea.vmem %s643_s2, %s450_s15 }
   0xf   : > { %v552_v3 = vld [vmem:[%s159_s18] sm:$0xff]  ;;  %236 = vmatpush.msra.mxu0 %v166_v12 }
  0x10   : > { %185 = vperm.xlu1 %482, %v552_v3   ;;  %175 = vperm.xlu0 %480, %v552_v3   ;;  %v298_v54 = vsel %vm204_vm1, %v552_v3, 1.0 }
  0x11   : > { %237 = vmatpush.msra.mxu0 %v165_v13  ;;  %355 = vmatpush.msra.mxu1 %v298_v54 }
  0x12   : > { %460 = vmatpush.msra.mxu2 %v298_v54  ;;  %461 = vmatpush.msra.mxu3 %v298_v54 }
  0x18   : > { %481 = vset.pattern.permute.xlu0 %v504_v4  ;;  %483 = vset.pattern.permute.xlu1 %v503_v2 }
  0x19   : > { %180 = vperm.xlu0 %481, %v552_v3   ;;  %170 = vperm.xlu1 %483, %v552_v3  }
  0x21   : > { %488 = vset.pattern.permute.xlu0 %v501_v0 }
  0x82   : > { %v186_v5 = vpop.permute.xlu1 %185  ;;  %v176_v6 = vpop.permute.xlu0 %175 }
  0x83   : > { %v188_v7 = vmul.f32 %v186_v5, %v552_v3  ;;  %v178_v8 = vmul.f32 %v176_v6, %v552_v3 }
  0x85   : > { %198 = vrot.lane.b32.xlu1 %v188_v7, %s505_s19  ;;  %190 = vrot.lane.b32.xlu2 %v178_v8, %s506_s20 }
  0x8b   : > { %v181_v9 = vpop.permute.xlu0 %180  ;;  %v171_v15 = vpop.permute.xlu1 %170 }
  0x8c   : > { %v183_v10 = vmul.f32 %v181_v9, %v552_v3  ;;  %v173_v17 = vmul.f32 %v171_v15, %v552_v3 }
  0x8e   : > { %194 = vrot.lane.b32.xlu2 %v183_v10, %s507_s21 }
  0x96   : > { %201 = vrot.lane.b32.xlu2 %v552_v3, %s508_s22 }
  0xdf   : > { %v191_v14 = vpop.permute.xlu2 %190 }
  0xe0   : > { %v205_v18 = vsel %vm204_vm1, %v173_v17, %v191_v14 }
  0xe8   : > { %v195_v16 = vpop.permute.xlu2 %194 }
  0xe9   : > { %v207_v20 = vsel %vm206_vm2, %v205_v18, %v195_v16 }
  0xf0   : > { %v202_v19 = vpop.permute.xlu2 %201 }
  0xf7   : > { %v199_v21 = vpop.permute.xlu1 %198 }
  0xf8   : > { %v209_v22 = vsel %vm208_vm3, %v207_v20, %v199_v21 }
  0xf9   : > { %v211_v23 = vsel %vm210_vm4, %v209_v22, %v202_v19 }
  0xfa   : > { %v213_v24 = vsel %vm212_vm5, %v211_v23, 1.0 }
  0xfb   : > { %453 = vmatmul.msk.f32.vlgmr.msra.gmra.mxu0 %vm214_vm6, %v213_v24 }
 0x178   : > { %v239_v25 = vpop.f32.mrf.mxu0 }
 0x179   : > { %v242_v26 = vsel %vm204_vm1, %v239_v25, -inf }
 0x17a   : > { %243 = vmax.xlane.f32.xlu0 %v242_v26 }
 0x1ed   : > { %v244_v27 = vpop.xlane.xlu0 %243 }
 0x1ee   : > { %v245_v28 = vsub.f32 %v239_v25, %v244_v27 }
 0x1f0   : > { %v246_v29 = vmul.f32 1.442695, %v245_v28 }
 0x1f2   : > { %489 = vpow2.f32 %v246_v29 }
 0x1f8   : > { %v490_v30 = vpop.eup %489 }
 0x1f9   : > { %v248_v31 = vsel %vm204_vm1, %v490_v30, 0.0 }
 0x1fa   : > { %249 = vadd.xlane.f32.xlu1 %v248_v31 }
 0x26d   : > { %v250_v32 = vpop.xlane.xlu1 %249 }
 0x26e   : > { %491 = vrcp.f32 %v250_v32 }
 0x274   : > { %v492_v33 = vpop.eup %491 }
 0x275   : > { %v252_v34 = vmul.f32 %v492_v33, %v250_v32 }
 0x277   : > { %v253_v35 = vsub.f32 2.0, %v252_v34 }
 0x279   : > { %v254_v36 = vmul.f32 %v492_v33, %v253_v35 }
 0x27b   : > { %v255_v37 = vmul.f32 %v490_v30, %v254_v36 }
 0x27d   : > { %256 = vst.msk [vmem:[%s163_s4] sm:$0xff] %vm204_vm1, %v255_v37  ;;  %259 = vperm.xlu2 %484, %v255_v37  }
 0x285   : > { %485 = vset.pattern.permute.xlu2 %v502_v1 }
 0x286   : > { %264 = vperm.xlu2 %485, %v255_v37  }
 0x28e   : > { %486 = vset.pattern.permute.xlu2 %v504_v4 }
 0x28f   : > { %269 = vperm.xlu2 %486, %v255_v37  }
 0x297   : > { %487 = vset.pattern.permute.xlu2 %v501_v0 }
 0x298   : > { %274 = vperm.xlu2 %487, %v255_v37  }
 0x2d7   : > { %v260_v38 = vpop.permute.xlu2 %259 }
 0x2d8   : > { %v262_v39 = vmul.f32 %v260_v38, %v552_v3 }
 0x2da   : > { %279 = vrot.lane.b32.xlu2 %v262_v39, %s506_s20 }
 0x2e0   : > { %v265_v40 = vpop.permute.xlu2 %264 }
 0x2e1   : > { %v267_v41 = vmul.f32 %v265_v40, %v552_v3 }
 0x2e3   : > { %283 = vrot.lane.b32.xlu2 %v267_v41, %s507_s21 }
 0x2e9   : > { %v270_v42 = vpop.permute.xlu2 %269 }
 0x2ea   : > { %v272_v43 = vmul.f32 %v270_v42, %v552_v3 }
 0x2ec   : > { %287 = vrot.lane.b32.xlu0 %v272_v43, %s505_s19 }
 0x2f2   : > { %v275_v44 = vpop.permute.xlu2 %274 }
 0x2f3   : > { %v277_v45 = vmul.f32 %v275_v44, %v552_v3 }
 0x2f5   : > { %291 = vrot.lane.b32.xlu1 %v277_v45, %s508_s22 }
 0x334   : > { %v280_v46 = vpop.permute.xlu2 %279 }
 0x335   : > { %v294_v49 = vsel %vm204_vm1, %v255_v37, %v280_v46 }
 0x33d   : > { %v284_v47 = vpop.permute.xlu2 %283 }
 0x33e   : > { %v295_v50 = vsel %vm206_vm2, %v294_v49, %v284_v47 }
 0x35e   : > { %v288_v48 = vpop.permute.xlu0 %287 }
 0x35f   : > { %v296_v51 = vsel %vm208_vm3, %v295_v50, %v288_v48 }
 0x367   : > { %v292_v52 = vpop.permute.xlu1 %291 }
 0x368   : > { %v297_v53 = vsel %vm210_vm4, %v296_v51, %v292_v52 }
 0x369   : > { %299 = vxpose.xlu2.b32.start.end [1/1] (short) (narrow) %v297_v53, 24 }
 0x402   : > { %v315_v55 = vpop.trf.xlu2 }
 0x403   : > { %454 = vmatmul.msk.f32.vlgmr.msra.gmra.mxu1 %vm206_vm2, %v315_v55 }
 0x40a   : > { %v316_v56 = vpop.trf.xlu2 }
 0x40b   : > { %455 = vmatmul.msk.f32.vlgmr.msra.gmra.mxu2 %vm206_vm2, %v316_v56 }
 0x412   : > { %v317_v57 = vpop.trf.xlu2 }
 0x413   : > { %456 = vmatmul.msk.f32.vlgmr.msra.gmra.mxu3 %vm206_vm2, %v317_v57 }
 0x480   : > { %v357_v58 = vpop.f32.mrf.mxu1 }
 0x48e   : > { %v360_v59 = vpop.f32.mrf.mxu2 }
 0x492   : > { %369 = sbr.rel (%p457_p4) target bundleno = 1179 (0x49b), region = 32 }
 0x496   : > { %v363_v60 = vpop.f32.mrf.mxu3 }
 0x497   : > { %vm370_vm7 = vcmask 39936   ;;  %vm373_vm8 = vcmask 35840   ;;  %v509_v61 = vmov 0.0  }
 0x498   : > { %371 = vst.msk [vmem:[%s644_s3] sm:$0xff] %vm370_vm7, %v509_v61 }
 0x499   : > { %372 = vst.msk [vmem:[%s644_s3 + $0x8] sm:$0xff] %vm370_vm7, %v509_v61 }
 0x49a   : > { %374 = vst.msk [vmem:[%s644_s3 + $0x10] sm:$0xf] %vm373_vm8, %v509_v61 }
 0x49b PF: > { %vm381_vm9 = vcmask 39936   ;;  %vm384_vm10 = vcmask 35840  }
 0x49f   : > { %v375_v62 = vld [vmem:[%s644_s3] sm:$0xff] }
 0x4a0   : > { %v376_v63 = vld [vmem:[%s644_s3 + $0x8] sm:$0xff]  ;;  %v378_v1 = vadd.f32 %v375_v62, %v357_v58 }
 0x4a1   : > { %v377_v0 = vld [vmem:[%s644_s3 + $0x10] sm:$0xf]  ;;  %v379_v2 = vadd.f32 %v376_v63, %v360_v59 }
 0x4a2   : > { %v380_v3 = vadd.f32 %v377_v0, %v363_v60  ;;  %382 = vst.msk [vmem:[%s644_s3] sm:$0xff] %vm381_vm9, %v378_v1 }
 0x4a3   : > { %383 = vst.msk [vmem:[%s644_s3 + $0x8] sm:$0xff] %vm381_vm9, %v379_v2 }
 0x4a4   : > { %385 = vst.msk [vmem:[%s644_s3 + $0x10] sm:$0xf] %vm384_vm10, %v380_v3 }
 0x4a5 PF: > { %s14_s12 = sadd.s32 1, %s499_s12  }
 0x4a6   : > { %p11_p5 = scmp.ge.s32.totalorder %s14_s12, 4  }
 0x4a8   :  { %13 = sbr.rel (!%p11_p5) target bundleno = 1 (0x1), region = 70 }

</bundles_post_ra>
